<compile_context>
chip_gen: v6e
topology: v6e:2x2x1
jax: 0.10.0
libtpu: 0.0.40
codegen_flags: <defaults>
</compile_context>

<pallas_src>
import functools
import math

import jax
import jax.numpy as jnp
from jax.experimental import pallas as pl
from jax.experimental.pallas import tpu as pltpu

LN_EPS = 1e-5  # torch.nn.LayerNorm default


def _round_up(n, m):
    return ((n + m - 1) // m) * m


def _packing_factor(d_model, win_size):
    """Rows stacked along lanes so the output store is lane-dense (>=128 wide)."""
    if d_model >= 128 or 128 % d_model != 0:
        return 1
    g = 128 // d_model
    if g * win_size * d_model > 1024:  # keep the (gK, gK) norm matrix small
        return 1
    return g


# -----------------------------------------------------------------------------
# Kernels
# -----------------------------------------------------------------------------
def _seg_merge_plain_kernel(x_ref, w_ref, b_ref, o_ref):
    """Un-packed rows: x (tm, K) -> o (tm, D).  Used when d_model >= 128."""
    x = x_ref[...].astype(jnp.float32)                      # (tm, K)
    mean = jnp.mean(x, axis=-1, keepdims=True)
    xc = x - mean
    var = jnp.mean(xc * xc, axis=-1, keepdims=True)
    xn = xc * jax.lax.rsqrt(var + LN_EPS)                   # affine folded into W
    y = jnp.dot(xn.astype(w_ref.dtype), w_ref[...],
                preferred_element_type=jnp.float32)         # bf16 MXU, f32 acc
    o_ref[...] = (y + b_ref[...]).astype(o_ref.dtype)


def _seg_merge_packed_kernel(x_ref, p_ref, w_ref, b_ref, o_ref):
    """g rows packed along lanes: x (tmg, g*K) -> o (tmg, g*D), g*D == 128.

    p_ref: constant segment-averaging matrix P (gK, gK) with
           P[k, k'] = 1/K if k, k' are in the same K-wide segment else 0,
           so x @ P broadcasts each segment's mean over that segment's lanes.
    w_ref: block-diagonal kron(I_g, W') weight (bf16).
    b_ref: g-tiled folded bias (f32).
    """
    x = x_ref[...].astype(jnp.float32)                      # (tmg, gK)
    p = p_ref[...]                                          # (gK, gK) f32
    mean = jnp.dot(x, p, preferred_element_type=jnp.float32)
    xc = x - mean
    var = jnp.dot(xc * xc, p, preferred_element_type=jnp.float32)
    xn = xc * jax.lax.rsqrt(var + LN_EPS)
    y = jnp.dot(xn.astype(w_ref.dtype), w_ref[...],
                preferred_element_type=jnp.float32)         # (tmg, gD) lane-dense
    o_ref[...] = (y + b_ref[...]).astype(o_ref.dtype)


# -----------------------------------------------------------------------------
# Parameters
# -----------------------------------------------------------------------------
def init_seg_merging_params(key, d_model, win_size):
    """Raw module parameters (torch Linear weight stored transposed as (K, D))."""
    K = win_size * d_model
    kw, kb, kg, kbeta = jax.random.split(key, 4)
    bound = 1.0 / math.sqrt(K)
    w = jax.random.uniform(kw, (K, d_model), jnp.float32, -bound, bound)
    b = jax.random.uniform(kb, (d_model,), jnp.float32, -bound, bound)
    # non-trivial LN affine so the affine-fold is actually exercised
    gamma = 1.0 + 0.1 * jax.random.normal(kg, (K,), jnp.float32)
    beta = 0.1 * jax.random.normal(kbeta, (K,), jnp.float32)
    return {"gamma": gamma, "beta": beta, "w": w, "b": b}


def prepare_seg_merging_params(raw, d_model, win_size):
    """Fold LN affine into the linear and lay weights out for the kernel.

    Done once at parameter-setup time (re-run per optimizer step when training),
    never per forward call.
    """
    K = win_size * d_model
    g = _packing_factor(d_model, win_size)
    w_f = raw["gamma"][:, None] * raw["w"]                  # (K, D)
    b_f = raw["beta"] @ raw["w"] + raw["b"]                 # (D,)
    w_packed = jnp.kron(jnp.eye(g, dtype=w_f.dtype), w_f).astype(jnp.bfloat16)
    b_packed = jnp.tile(b_f[None, :], (1, g)).astype(jnp.float32)
    if g > 1:
        seg = jnp.arange(g * K) // K
        p = (seg[:, None] == seg[None, :]).astype(jnp.float32) / float(K)
    else:
        p = None
    return {"w": w_packed, "b": b_packed, "p": p}


# -----------------------------------------------------------------------------
# Forward
# -----------------------------------------------------------------------------
def seg_merging_forward(x, params, *, win_size, tm=512):
    """x: (B, ts_d, seg_num, d_model) -> (B, ts_d, ceil(seg_num/win), d_model)."""
    B, T, S, D = x.shape
    K = win_size * D

    # --- torch-style segment padding (repeat trailing segments) -----------------
    pad = (-S) % win_size
    if pad:
        x = jnp.concatenate([x, x[:, :, -pad:, :]], axis=2)
    seg_out = x.shape[2] // win_size

    # --- merge: 'b t (s w) d -> (b t s) (w d)'  (free row-major reshape) --------
    M = B * T * seg_out
    x2d = x.reshape(M, K)

    g = _packing_factor(D, win_size)
    gK, gD = g * K, g * D
    assert params["w"].shape == (gK, gD), "params prepared for different shapes"

    # --- row tiling: large tiles (default 512), zero-pad the tail ---------------
    row_align = 8 * g                       # packed sublane dim must stay /8
    tm_eff = _round_up(max(row_align, min(tm, _round_up(M, row_align))), row_align)
    m_pad = _round_up(M, tm_eff)
    if m_pad != M:
        x2d = jnp.concatenate([x2d, jnp.zeros((m_pad - M, K), x2d.dtype)], axis=0)

    grid = (m_pad // tm_eff,)
    tmg = tm_eff // g
    x_packed = x2d.reshape(m_pad // g, gK)  # lane-packing: free in the wrapper

    # --- VMEM budget: double-buffered tiles + grid-invariant operands -----------
    itm = x2d.dtype.itemsize
    need = 2 * (tmg * gK * itm) + 2 * (tmg * gD * itm) + 2 * (gK * gD * 2) + 2 * (gD * 4)
    if g > 1:
        need += 2 * (gK * gK * 4)
    vmem_limit = int(min(max(4 * need, 4 * 2 ** 20), 56 * 2 ** 20))  # < v7x 64 MiB

    if g > 1:
        kernel = _seg_merge_packed_kernel
        operands = (x_packed, params["p"], params["w"], params["b"])
        in_specs = [
            pl.BlockSpec((tmg, gK), lambda i: (i, 0)),   # activations
            pl.BlockSpec((gK, gK), lambda i: (0, 0)),    # segment-mean matrix
            pl.BlockSpec((gK, gD), lambda i: (0, 0)),    # block-diag folded weight
            pl.BlockSpec((1, gD), lambda i: (0, 0)),     # folded bias
        ]
    else:
        kernel = _seg_merge_plain_kernel
        operands = (x_packed, params["w"], params["b"])
        in_specs = [
            pl.BlockSpec((tmg, gK), lambda i: (i, 0)),
            pl.BlockSpec((gK, gD), lambda i: (0, 0)),
            pl.BlockSpec((1, gD), lambda i: (0, 0)),
        ]

    out_packed = pl.pallas_call(
        kernel,
        out_shape=jax.ShapeDtypeStruct((m_pad // g, gD), x.dtype),
        grid_spec=pltpu.PrefetchScalarGridSpec(
            num_scalar_prefetch=0,
            grid=grid,
            in_specs=in_specs,
            out_specs=pl.BlockSpec((tmg, gD), lambda i: (i, 0)),
        ),
        compiler_params=pltpu.CompilerParams(
            dimension_semantics=("parallel",),
            vmem_limit_bytes=vmem_limit,
        ),
    )(*operands)

    out2d = out_packed.reshape(m_pad, D)[:M]
    return out2d.reshape(B, T, seg_out, D)


# -----------------------------------------------------------------------------
# Pure-JAX reference (faithful replica of the torch module, f32, unfolded params)
# -----------------------------------------------------------------------------
def seg_merging_reference(x, raw, win_size):
    B, T, S, D = x.shape
    pad = (-S) % win_size
    if pad:
        x = jnp.concatenate([x, x[:, :, -pad:, :]], axis=2)
    parts = [x[:, :, i::win_size, :] for i in range(win_size)]
    xm = jnp.concatenate(parts, axis=-1)
    mean = jnp.mean(xm, axis=-1, keepdims=True)
    var = jnp.mean((xm - mean) ** 2, axis=-1, keepdims=True)
    xn = (xm - mean) / jnp.sqrt(var + LN_EPS)
    xn = xn * raw["gamma"] + raw["beta"]
    return xn @ raw["w"] + raw["b"]


if __name__ == "__main__":
    key = jax.random.PRNGKey(0)
    # (B, ts_d, seg_num, d_model, win_size, row-tile override)
    configs = [
        (2, 4, 8, 32, 2, 512),    # packed lane-dense path (g=4), single tile
        (1, 3, 7, 32, 2, 512),    # odd seg_num -> segment pad + zero row padding
        (2, 4, 16, 32, 2, 32),    # multi-step grid (2 tiles), revisited weights
        (2, 2, 4, 128, 2, 512),   # d_model >= 128 -> plain path (already lane-dense)
    ]
    for cfg_idx, (B, T, S, D, win, tm) in enumerate(configs):
        key, kx, kp = jax.random.split(key, 3)
        x = jax.random.normal(kx, (B, T, S, D), jnp.float32)
        raw = init_seg_merging_params(kp, D, win)
        prep = prepare_seg_merging_params(raw, D, win)

        fwd = jax.jit(functools.partial(seg_merging_forward, win_size=win, tm=tm))
        out = fwd(x, prep)
        jax.block_until_ready(out)

        ref = seg_merging_reference(x, raw, win)
        assert out.shape == ref.shape, (cfg_idx, out.shape, ref.shape)
        err = float(jnp.max(jnp.abs(out - ref)))
        # bf16 MXU feed with f32 accumulation -> slightly looser tolerance
        assert err < 5e-2, (cfg_idx, err)
    print("KERNEL_OK")
</pallas_src>

<mosaic_0001>
module attributes {stable_mosaic.version = 11 : i64} {
  func.func @_seg_merge_packed_kernel(%arg0: i32, %arg1: memref<8x256xf32, #tpu.memory_space<vmem>>, %arg2: memref<256x256xf32, #tpu.memory_space<vmem>>, %arg3: memref<256x128xbf16, #tpu.memory_space<vmem>>, %arg4: memref<1x128xf32, #tpu.memory_space<vmem>>, %arg5: memref<8x128xf32, #tpu.memory_space<vmem>>) attributes {dimension_semantics = [#tpu.dimension_semantics<parallel>], iteration_bounds = array<i64: 1>, scalar_prefetch = 0 : i64, scratch_operands = 0 : i64, tpu.core_type = #tpu.core_type<tc>, window_params = [{transform_indices = @transform_0, window_bounds = array<i64: 8, 256>}, {pipeline_mode = #tpu.pipeline_mode<synchronous>, transform_indices = @transform_1, window_bounds = array<i64: 256, 256>}, {pipeline_mode = #tpu.pipeline_mode<synchronous>, transform_indices = @transform_2, window_bounds = array<i64: 256, 128>}, {pipeline_mode = #tpu.pipeline_mode<synchronous>, transform_indices = @transform_3, window_bounds = array<i64: 1, 128>}, {transform_indices = @transform_4, window_bounds = array<i64: 8, 128>}]} {
    %c0 = arith.constant 0 : index
    %c0_0 = arith.constant 0 : index
    %0 = vector.load %arg1[%c0, %c0_0] : memref<8x256xf32, #tpu.memory_space<vmem>>, vector<8x256xf32>
    %c0_1 = arith.constant 0 : index
    %c0_2 = arith.constant 0 : index
    %1 = vector.load %arg2[%c0_1, %c0_2] : memref<256x256xf32, #tpu.memory_space<vmem>>, vector<256x256xf32>
    %cst = arith.constant dense<0.000000e+00> : vector<8x256xf32>
    %2 = tpu.matmul %0, %1, %cst {dimension_numbers = #tpu.dot_dimension_numbers<[1], [0], [0], [1], [0, 0, 1, 1], [], []>} : vector<8x256xf32>, vector<256x256xf32>, vector<8x256xf32> -> vector<8x256xf32>
    %3 = arith.subf %0, %2 : vector<8x256xf32>
    %4 = arith.mulf %3, %3 : vector<8x256xf32>
    %cst_3 = arith.constant dense<0.000000e+00> : vector<8x256xf32>
    %5 = tpu.matmul %4, %1, %cst_3 {dimension_numbers = #tpu.dot_dimension_numbers<[1], [0], [0], [1], [0, 0, 1, 1], [], []>} : vector<8x256xf32>, vector<256x256xf32>, vector<8x256xf32> -> vector<8x256xf32>
    %cst_4 = arith.constant 9.99999974E-6 : f32
    %6 = vector.broadcast %cst_4 : f32 to vector<8x256xf32>
    %7 = arith.addf %5, %6 : vector<8x256xf32>
    %8 = math.rsqrt %7 : vector<8x256xf32>
    %9 = arith.mulf %3, %8 : vector<8x256xf32>
    %10 = arith.truncf %9 : vector<8x256xf32> to vector<8x256xbf16>
    %c0_5 = arith.constant 0 : index
    %c0_6 = arith.constant 0 : index
    %11 = vector.load %arg3[%c0_5, %c0_6] : memref<256x128xbf16, #tpu.memory_space<vmem>>, vector<256x128xbf16>
    %cst_7 = arith.constant dense<0.000000e+00> : vector<8x128xf32>
    %12 = tpu.matmul %10, %11, %cst_7 {dimension_numbers = #tpu.dot_dimension_numbers<[1], [0], [0], [1], [0, 0, 1, 1], [], []>} : vector<8x256xbf16>, vector<256x128xbf16>, vector<8x128xf32> -> vector<8x128xf32>
    %c0_8 = arith.constant 0 : index
    %c0_9 = arith.constant 0 : index
    %13 = vector.load %arg4[%c0_8, %c0_9] : memref<1x128xf32, #tpu.memory_space<vmem>>, vector<1x128xf32>
    %14 = vector.broadcast %13 : vector<1x128xf32> to vector<8x128xf32>
    %15 = arith.addf %12, %14 : vector<8x128xf32>
    %c0_10 = arith.constant 0 : index
    %c0_11 = arith.constant 0 : index
    %16 = vector.load %arg5[%c0_10, %c0_11] : memref<8x128xf32, #tpu.memory_space<vmem>>, vector<8x128xf32>
    tpu.vector_store %arg5[%c0_10, %c0_11], %15 {strides = array<i32>} : memref<8x128xf32, #tpu.memory_space<vmem>>, vector<8x128xf32>,
    return
  }
  func.func @transform_0(%arg0: i32) -> (i32, i32) {
    %c0_i32 = arith.constant 0 : i32
    %c0_i32_0 = arith.constant 0 : i32
    return %arg0, %c0_i32 : i32, i32
  }
  func.func @transform_1(%arg0: i32) -> (i32, i32) {
    %c0_i32 = arith.constant 0 : i32
    %c0_i32_0 = arith.constant 0 : i32
    %c0_i32_1 = arith.constant 0 : i32
    return %c0_i32, %c0_i32_0 : i32, i32
  }
  func.func @transform_2(%arg0: i32) -> (i32, i32) {
    %c0_i32 = arith.constant 0 : i32
    %c0_i32_0 = arith.constant 0 : i32
    %c0_i32_1 = arith.constant 0 : i32
    return %c0_i32, %c0_i32_0 : i32, i32
  }
  func.func @transform_3(%arg0: i32) -> (i32, i32) {
    %c0_i32 = arith.constant 0 : i32
    %c0_i32_0 = arith.constant 0 : i32
    %c0_i32_1 = arith.constant 0 : i32
    return %c0_i32, %c0_i32_0 : i32, i32
  }
  func.func @transform_4(%arg0: i32) -> (i32, i32) {
    %c0_i32 = arith.constant 0 : i32
    %c0_i32_0 = arith.constant 0 : i32
    return %arg0, %c0_i32 : i32, i32
  }
}

</mosaic_0001>

<bundles_post_ra>
// kernel: seg_merging_forward.1
= control target key start
LH: loop header
LB: loop body
LE: loop exit
PB: predicated region body
PF: predicated region fallthrough
CT: control target
= control target key end

     0   :  { %9 = vsyncpa [#allocation3], 0  ;;  %s608_s0 = inlined_call_operand.vmem [shape: f32[8,256], index: 0, kind: input, shape index: {}]   ;;  %s609_s1 = inlined_call_operand.hbm [shape: f32[256,256], index: 1, kind: input, shape index: {}]   ;;  %s610_s2 = inlined_call_operand.hbm [shape: bf16[256,128], index: 2, kind: input, shape index: {}]   ;;  %s611_s3 = inlined_call_operand.vmem [shape: f32[1,128], index: 3, kind: input, shape index: {}]   ;;  %s612_s4 = inlined_call_operand.vmem [shape: f32[8,128], index: 4, kind: output, shape index: {}]  }
   0x1   :  { %10 = vsyncpa [#allocation5], 0  ;;  %s555_s15 = smov [#allocation2]  }
   0x2   :  { %s18_s16 = sshll.u32 %s555_s15, 4  ;;  %s19_s16 = int_to_ptr.vmem [resolvable:$true] %s18_s16 }
   0x3   :  { %s519_s17 = scalar_lea.vmem %s19_s16, 8192  ;;  %p524_p1 = scmp.lt.s32.totalorder %s19_s16, %s19_s16 }
   0x4   :  { %p520_p0 = scmp.ne.s32.totalorder %s19_s16, %s519_s17  ;;  %p525_p2 = scmp.lt.s32.totalorder %s519_s17, %s519_s17 }
   0x6   :  { %p526_p3 = por %p525_p2, %p524_p1 }
   0x8   :  { %p527_p4 = pnand %p526_p3, %p520_p0 }
   0xa   :  { %530 = shalt.err (!%p527_p4)
}
   0xb   :  { %s556_s18 = smov 256   ;;  %s557_s19 = smov 16  }
   0xc   :  { %24 = dma.hbm_to_vmem [thread:$0]  %s609_s1, 8192, %s19_s16, [#allocation3], %s556_s18, %s556_s18, %s557_s19  }
   0xd   :  { %s558_s22 = smov [#allocation4]  }
   0xe   :  { %s30_s23 = sshll.u32 %s558_s22, 4  ;;  %s31_s23 = int_to_ptr.vmem [resolvable:$true] %s30_s23 }
   0xf   :  { %s539_s24 = scalar_lea.vmem %s31_s23, 2048  ;;  %p544_p6 = scmp.lt.s32.totalorder %s31_s23, %s31_s23 }
  0x10   :  { %p540_p5 = scmp.ne.s32.totalorder %s31_s23, %s539_s24  ;;  %p545_p7 = scmp.lt.s32.totalorder %s539_s24, %s539_s24 }
  0x12   :  { %p546_p8 = por %p545_p7, %p544_p6 }
  0x14   :  { %p547_p9 = pnand %p546_p8, %p540_p5 }
  0x16   :  { %550 = shalt.err (!%p547_p9)
}
  0x17   :  { %s559_s25 = smov 64   ;;  %s560_s26 = smov 4  }
  0x18   :  { %36 = dma.hbm_to_vmem [thread:$0]  %s610_s2, 2048, %s31_s23, [#allocation5], %s559_s25, %s559_s25, %s560_s26  }
  0x19   :  { %551 = dma.done.wait [#allocation3], 8192  }
  0x1a   :  { %552 = vsyncadd [#allocation3], 4294959104 }
  0x1b   :  { %553 = dma.done.wait [#allocation5], 2048  }
  0x1c   :  { %554 = vsyncadd [#allocation5], 4294965248  ;;  %v79_v0 = vld [vmem:[#allocation2 + $0xf8] sm:$0xff]  ;;  %v78_v1 = vld [vmem:[#allocation2 + $0xf0] sm:$0xff] }
  0x1d   :  { %v77_v2 = vld [vmem:[#allocation2 + $0xe8] sm:$0xff]  ;;  %112 = vmatprep.subr.mxu0 %v79_v0  ;;  %v76_v3 = vld [vmem:[#allocation2 + $0xe0] sm:$0xff]  ;;  %187 = vmatprep.subr.mxu1 %v79_v0  ;;  %v75_v4 = vld [vmem:[#allocation2 + $0xd8] sm:$0xff] }
  0x1e   :  { %113 = vmatpush1.msra.mxu0 %v78_v1  ;;  %188 = vmatpush1.msra.mxu1 %v78_v1  ;;  %v74_v5 = vld [vmem:[#allocation2 + $0xd0] sm:$0xff]  ;;  %v73_v6 = vld [vmem:[#allocation2 + $0xc8] sm:$0xff]  ;;  %v72_v7 = vld [vmem:[#allocation2 + $0xc0] sm:$0xff] }
  0x1f   :  { %114 = vmatprep.subr.mxu0 %v77_v2  ;;  %189 = vmatprep.subr.mxu1 %v77_v2  ;;  %v71_v8 = vld [vmem:[#allocation2 + $0xb8] sm:$0xff]  ;;  %v70_v9 = vld [vmem:[#allocation2 + $0xb0] sm:$0xff]  ;;  %v69_v10 = vld [vmem:[#allocation2 + $0xa8] sm:$0xff] }
  0x20   :  { %115 = vmatpush1.msra.mxu0 %v76_v3  ;;  %190 = vmatpush1.msra.mxu1 %v76_v3  ;;  %v68_v11 = vld [vmem:[#allocation2 + $0xa0] sm:$0xff]  ;;  %v67_v12 = vld [vmem:[#allocation2 + $0x98] sm:$0xff]  ;;  %v66_v13 = vld [vmem:[#allocation2 + $0x90] sm:$0xff] }
  0x21   :  { %116 = vmatprep.subr.mxu0 %v75_v4  ;;  %191 = vmatprep.subr.mxu1 %v75_v4  ;;  %v65_v14 = vld [vmem:[#allocation2 + $0x88] sm:$0xff]  ;;  %v64_v15 = vld [vmem:[#allocation2 + $0x80] sm:$0xff]  ;;  %v63_v16 = vld [vmem:[#allocation2 + $0x78] sm:$0xff] }
  0x22   :  { %117 = vmatpush1.msra.mxu0 %v74_v5  ;;  %192 = vmatpush1.msra.mxu1 %v74_v5  ;;  %v62_v17 = vld [vmem:[#allocation2 + $0x70] sm:$0xff]  ;;  %v61_v18 = vld [vmem:[#allocation2 + $0x68] sm:$0xff]  ;;  %v60_v19 = vld [vmem:[#allocation2 + $0x60] sm:$0xff] }
  0x23   :  { %118 = vmatprep.subr.mxu0 %v73_v6  ;;  %193 = vmatprep.subr.mxu1 %v73_v6  ;;  %v59_v20 = vld [vmem:[#allocation2 + $0x58] sm:$0xff]  ;;  %v58_v21 = vld [vmem:[#allocation2 + $0x50] sm:$0xff]  ;;  %v57_v22 = vld [vmem:[#allocation2 + $0x48] sm:$0xff] }
  0x24   :  { %119 = vmatpush1.msra.mxu0 %v72_v7  ;;  %194 = vmatpush1.msra.mxu1 %v72_v7  ;;  %v56_v23 = vld [vmem:[#allocation2 + $0x40] sm:$0xff]  ;;  %v55_v24 = vld [vmem:[#allocation2 + $0x38] sm:$0xff]  ;;  %v54_v25 = vld [vmem:[#allocation2 + $0x30] sm:$0xff] }
  0x25   :  { %120 = vmatprep.subr.mxu0 %v71_v8  ;;  %195 = vmatprep.subr.mxu1 %v71_v8  ;;  %v595_v26 = vld [vmem:[%s608_s0 + $0x8] sm:$0xff]  ;;  %v52_v28 = vld [vmem:[#allocation2 + $0x20] sm:$0xff]  ;;  %v51_v29 = vld [vmem:[#allocation2 + $0x18] sm:$0xff] }
  0x26   :  { %121 = vmatpush1.msra.mxu0 %v70_v9  ;;  %196 = vmatpush1.msra.mxu1 %v70_v9  ;;  %v53_v27 = vld [vmem:[#allocation2 + $0x28] sm:$0xff]  ;;  %v50_v30 = vld [vmem:[#allocation2 + $0x10] sm:$0xff]  ;;  %v48_v32 = vld [vmem:[#allocation2] sm:$0xff] }
  0x27   :  { %122 = vmatprep.subr.mxu0 %v69_v10  ;;  %197 = vmatprep.subr.mxu1 %v69_v10  ;;  %v49_v31 = vld [vmem:[#allocation2 + $0x8] sm:$0xff]  ;;  %v111_v33 = vld [vmem:[#allocation2 + $0x1f8] sm:$0xff]  ;;  %v110_v34 = vld [vmem:[#allocation2 + $0x1f0] sm:$0xff] }
  0x28   :  { %123 = vmatpush1.msra.mxu0 %v68_v11  ;;  %198 = vmatpush1.msra.mxu1 %v68_v11  ;;  %v109_v35 = vld [vmem:[#allocation2 + $0x1e8] sm:$0xff]  ;;  %v108_v36 = vld [vmem:[#allocation2 + $0x1e0] sm:$0xff]  ;;  %v107_v37 = vld [vmem:[#allocation2 + $0x1d8] sm:$0xff] }
  0x29   :  { %124 = vmatprep.subr.mxu0 %v67_v12  ;;  %199 = vmatprep.subr.mxu1 %v67_v12  ;;  %v106_v38 = vld [vmem:[#allocation2 + $0x1d0] sm:$0xff]  ;;  %v105_v39 = vld [vmem:[#allocation2 + $0x1c8] sm:$0xff]  ;;  %v104_v40 = vld [vmem:[#allocation2 + $0x1c0] sm:$0xff] }
  0x2a   :  { %125 = vmatpush1.msra.mxu0 %v66_v13  ;;  %200 = vmatpush1.msra.mxu1 %v66_v13  ;;  %v103_v41 = vld [vmem:[#allocation2 + $0x1b8] sm:$0xff]  ;;  %v102_v42 = vld [vmem:[#allocation2 + $0x1b0] sm:$0xff]  ;;  %v101_v43 = vld [vmem:[#allocation2 + $0x1a8] sm:$0xff] }
  0x2b   :  { %126 = vmatprep.subr.mxu0 %v65_v14  ;;  %201 = vmatprep.subr.mxu1 %v65_v14  ;;  %v100_v44 = vld [vmem:[#allocation2 + $0x1a0] sm:$0xff]  ;;  %v99_v45 = vld [vmem:[#allocation2 + $0x198] sm:$0xff]  ;;  %v98_v46 = vld [vmem:[#allocation2 + $0x190] sm:$0xff] }
  0x2c   :  { %127 = vmatpush1.msra.mxu0 %v64_v15  ;;  %202 = vmatpush1.msra.mxu1 %v64_v15  ;;  %v97_v47 = vld [vmem:[#allocation2 + $0x188] sm:$0xff]  ;;  %v96_v48 = vld [vmem:[#allocation2 + $0x180] sm:$0xff]  ;;  %v95_v49 = vld [vmem:[#allocation2 + $0x178] sm:$0xff] }
  0x2d   :  { %128 = vmatprep.subr.mxu0 %v63_v16  ;;  %203 = vmatprep.subr.mxu1 %v63_v16  ;;  %v94_v50 = vld [vmem:[#allocation2 + $0x170] sm:$0xff]  ;;  %v93_v51 = vld [vmem:[#allocation2 + $0x168] sm:$0xff]  ;;  %v92_v52 = vld [vmem:[#allocation2 + $0x160] sm:$0xff] }
  0x2e   :  { %129 = vmatpush1.msra.mxu0 %v62_v17  ;;  %204 = vmatpush1.msra.mxu1 %v62_v17  ;;  %v91_v53 = vld [vmem:[#allocation2 + $0x158] sm:$0xff]  ;;  %v90_v54 = vld [vmem:[#allocation2 + $0x150] sm:$0xff]  ;;  %v89_v55 = vld [vmem:[#allocation2 + $0x148] sm:$0xff] }
  0x2f   :  { %130 = vmatprep.subr.mxu0 %v61_v18  ;;  %205 = vmatprep.subr.mxu1 %v61_v18  ;;  %v88_v56 = vld [vmem:[#allocation2 + $0x140] sm:$0xff]  ;;  %v87_v57 = vld [vmem:[#allocation2 + $0x138] sm:$0xff]  ;;  %v86_v58 = vld [vmem:[#allocation2 + $0x130] sm:$0xff] }
  0x30   :  { %131 = vmatpush1.msra.mxu0 %v60_v19  ;;  %206 = vmatpush1.msra.mxu1 %v60_v19  ;;  %v85_v59 = vld [vmem:[#allocation2 + $0x128] sm:$0xff]  ;;  %v84_v60 = vld [vmem:[#allocation2 + $0x120] sm:$0xff]  ;;  %v83_v61 = vld [vmem:[#allocation2 + $0x118] sm:$0xff] }
  0x31   :  { %132 = vmatprep.subr.mxu0 %v59_v20  ;;  %207 = vmatprep.subr.mxu1 %v59_v20  ;;  %v82_v62 = vld [vmem:[#allocation2 + $0x110] sm:$0xff]  ;;  %v81_v63 = vld [vmem:[#allocation2 + $0x108] sm:$0xff]  ;;  %v80_v0 = vld [vmem:[#allocation2 + $0x100] sm:$0xff] }
  0x32   :  { %133 = vmatpush1.msra.mxu0 %v58_v21  ;;  %176 = vmatprep.mubr.f32.mxu0 %v595_v26  ;;  %v46_v1 = vld [vmem:[%s608_s0] sm:$0xff]  ;;  %v491_v2 = vld [vmem:[#allocation4 + $0x78] sm:$0xff]   ;;  %v493_v4 = vld [vmem:[#allocation4 + $0x70] sm:$0xff]  }
  0x33   :  { %134 = vmatprep.subr.mxu0 %v57_v22  ;;  %208 = vmatpush1.msra.mxu1 %v58_v21  ;;  %v492_v3 = vld [vmem:[#allocation4 + $0x38] sm:$0xff]   ;;  %v494_v5 = vld [vmem:[#allocation4 + $0x30] sm:$0xff]   ;;  %v495_v12 = vld [vmem:[#allocation4 + $0x68] sm:$0xff]  }
  0x34   :  { %135 = vmatpush1.msra.mxu0 %v56_v23  ;;  %209 = vmatprep.subr.mxu1 %v57_v22  ;;  %v496_v13 = vld [vmem:[#allocation4 + $0x28] sm:$0xff]   ;;  %v497_v14 = vld [vmem:[#allocation4 + $0x60] sm:$0xff]   ;;  %v499_v16 = vld [vmem:[#allocation4 + $0x58] sm:$0xff]  }
  0x35   :  { %136 = vmatprep.subr.mxu0 %v55_v24  ;;  %210 = vmatpush1.msra.mxu1 %v56_v23  ;;  %v498_v15 = vld [vmem:[#allocation4 + $0x20] sm:$0xff]   ;;  %v500_v17 = vld [vmem:[#allocation4 + $0x18] sm:$0xff]   ;;  %v501_v18 = vld [vmem:[#allocation4 + $0x50] sm:$0xff]  }
  0x36   :  { %137 = vmatpush1.msra.mxu0 %v54_v25  ;;  %211 = vmatprep.subr.mxu1 %v55_v24  ;;  %v502_v19 = vld [vmem:[#allocation4 + $0x10] sm:$0xff]   ;;  %v503_v20 = vld [vmem:[#allocation4 + $0x48] sm:$0xff]   ;;  %v505_v22 = vld [vmem:[#allocation4 + $0x40] sm:$0xff]  }
  0x37   :  { %138 = vmatprep.subr.mxu0 %v53_v27  ;;  %212 = vmatpush1.msra.mxu1 %v54_v25  ;;  %v504_v21 = vld [vmem:[#allocation4 + $0x8] sm:$0xff]   ;;  %v506_v23 = vld [vmem:[#allocation4] sm:$0xff]  }
  0x38   :  { %139 = vmatpush1.msra.mxu0 %v52_v28  ;;  %213 = vmatprep.subr.mxu1 %v53_v27 }
  0x39   :  { %140 = vmatprep.subr.mxu0 %v51_v29  ;;  %214 = vmatpush1.msra.mxu1 %v52_v28 }
  0x3a   :  { %141 = vmatpush1.msra.mxu0 %v50_v30  ;;  %215 = vmatprep.subr.mxu1 %v51_v29 }
  0x3b   :  { %142 = vmatprep.subr.mxu0 %v49_v31  ;;  %216 = vmatpush1.msra.mxu1 %v50_v30 }
  0x3c   :  { %143 = vmatpush1.msra.mxu0 %v48_v32  ;;  %217 = vmatprep.subr.mxu1 %v49_v31 }
  0x3d   :  { %144 = vmatprep.subr.mxu0 %v111_v33  ;;  %218 = vmatpush1.msra.mxu1 %v48_v32 }
  0x3e   :  { %145 = vmatpush2.msra.mxu0 %v110_v34  ;;  %219 = vmatprep.subr.mxu1 %v111_v33 }
  0x3f   :  { %146 = vmatprep.subr.mxu0 %v109_v35  ;;  %220 = vmatpush2.msra.mxu1 %v110_v34 }
  0x40   :  { %147 = vmatpush2.msra.mxu0 %v108_v36  ;;  %221 = vmatprep.subr.mxu1 %v109_v35  ;;  %v446_v35 = vld [vmem:[%s611_s3] ss:$0 sm:$0xff] }
  0x41   :  { %148 = vmatprep.subr.mxu0 %v107_v37  ;;  %222 = vmatpush2.msra.mxu1 %v108_v36 }
  0x42   :  { %149 = vmatpush2.msra.mxu0 %v106_v38  ;;  %223 = vmatprep.subr.mxu1 %v107_v37 }
  0x43   :  { %150 = vmatprep.subr.mxu0 %v105_v39  ;;  %224 = vmatpush2.msra.mxu1 %v106_v38 }
  0x44   :  { %151 = vmatpush2.msra.mxu0 %v104_v40  ;;  %225 = vmatprep.subr.mxu1 %v105_v39 }
  0x45   :  { %152 = vmatprep.subr.mxu0 %v103_v41  ;;  %226 = vmatpush2.msra.mxu1 %v104_v40 }
  0x46   :  { %153 = vmatpush2.msra.mxu0 %v102_v42  ;;  %227 = vmatprep.subr.mxu1 %v103_v41 }
  0x47   :  { %154 = vmatprep.subr.mxu0 %v101_v43  ;;  %228 = vmatpush2.msra.mxu1 %v102_v42 }
  0x48   :  { %155 = vmatpush2.msra.mxu0 %v100_v44  ;;  %229 = vmatprep.subr.mxu1 %v101_v43 }
  0x49   :  { %156 = vmatprep.subr.mxu0 %v99_v45  ;;  %230 = vmatpush2.msra.mxu1 %v100_v44 }
  0x4a   :  { %157 = vmatpush2.msra.mxu0 %v98_v46  ;;  %231 = vmatprep.subr.mxu1 %v99_v45 }
  0x4b   :  { %158 = vmatprep.subr.mxu0 %v97_v47  ;;  %232 = vmatpush2.msra.mxu1 %v98_v46 }
  0x4c   :  { %159 = vmatpush2.msra.mxu0 %v96_v48  ;;  %233 = vmatprep.subr.mxu1 %v97_v47 }
  0x4d   :  { %160 = vmatprep.subr.mxu0 %v95_v49  ;;  %234 = vmatpush2.msra.mxu1 %v96_v48 }
  0x4e   :  { %161 = vmatpush2.msra.mxu0 %v94_v50  ;;  %235 = vmatprep.subr.mxu1 %v95_v49 }
  0x4f   :  { %162 = vmatprep.subr.mxu0 %v93_v51  ;;  %236 = vmatpush2.msra.mxu1 %v94_v50 }
  0x50   :  { %163 = vmatpush2.msra.mxu0 %v92_v52  ;;  %237 = vmatprep.subr.mxu1 %v93_v51 }
  0x51   :  { %164 = vmatprep.subr.mxu0 %v91_v53  ;;  %238 = vmatpush2.msra.mxu1 %v92_v52 }
  0x52   :  { %165 = vmatpush2.msra.mxu0 %v90_v54  ;;  %239 = vmatprep.subr.mxu1 %v91_v53 }
  0x53   :  { %166 = vmatprep.subr.mxu0 %v89_v55  ;;  %240 = vmatpush2.msra.mxu1 %v90_v54 }
  0x54   :  { %167 = vmatpush2.msra.mxu0 %v88_v56  ;;  %241 = vmatprep.subr.mxu1 %v89_v55 }
  0x55   :  { %168 = vmatprep.subr.mxu0 %v87_v57  ;;  %242 = vmatpush2.msra.mxu1 %v88_v56 }
  0x56   :  { %169 = vmatpush2.msra.mxu0 %v86_v58  ;;  %243 = vmatprep.subr.mxu1 %v87_v57 }
  0x57   :  { %170 = vmatprep.subr.mxu0 %v85_v59  ;;  %244 = vmatpush2.msra.mxu1 %v86_v58 }
  0x58   :  { %171 = vmatpush2.msra.mxu0 %v84_v60  ;;  %245 = vmatprep.subr.mxu1 %v85_v59 }
  0x59   :  { %172 = vmatprep.subr.mxu0 %v83_v61  ;;  %246 = vmatpush2.msra.mxu1 %v84_v60 }
  0x5a   :  { %173 = vmatpush2.msra.mxu0 %v82_v62  ;;  %247 = vmatprep.subr.mxu1 %v83_v61 }
  0x5b   :  { %174 = vmatprep.subr.mxu0 %v81_v63  ;;  %248 = vmatpush2.msra.mxu1 %v82_v62 }
  0x5c   :  { %175 = vmatpush2.msra.mxu0 %v80_v0  ;;  %249 = vmatprep.subr.mxu1 %v81_v63 }
  0x5d   :  { %177 = vmatmul.mubr.f32.vlgmr.msra.gmra.mxu0 %v46_v1  ;;  %250 = vmatpush2.msra.mxu1 %v80_v0 }
  0x5e   :  { %463 = vmatprep.subr.bf16.mxu0 %v491_v2 }
  0x5f   :  { %464 = vmatpush3.bf16.msra.mxu0 %v492_v3 }
  0x60   :  { %465 = vmatprep.subr.bf16.mxu0 %v493_v4 }
  0x63   :  { %466 = vmatpush3.bf16.msra.mxu0 %v494_v5 }
  0x64   :  { %467 = vmatprep.subr.bf16.mxu0 %v495_v12 }
  0x67   :  { %468 = vmatpush3.bf16.msra.mxu0 %v496_v13 }
  0x68   :  { %469 = vmatprep.subr.bf16.mxu0 %v497_v14 }
  0x6b   :  { %470 = vmatpush3.bf16.msra.mxu0 %v498_v15 }
  0x6c   :  { %471 = vmatprep.subr.bf16.mxu0 %v499_v16 }
  0x6f   :  { %472 = vmatpush3.bf16.msra.mxu0 %v500_v17 }
  0x70   :  { %473 = vmatprep.subr.bf16.mxu0 %v501_v18 }
  0x73   :  { %474 = vmatpush3.bf16.msra.mxu0 %v502_v19 }
  0x74   :  { %475 = vmatprep.subr.bf16.mxu0 %v503_v20 }
  0x77   :  { %476 = vmatpush3.bf16.msra.mxu0 %v504_v21 }
  0x78   :  { %477 = vmatprep.subr.bf16.mxu0 %v505_v22 }
  0x7b   :  { %478 = vmatpush3.bf16.msra.mxu0 %v506_v23 }
 0x11d   :  { %v178_v6 = vpop.f32.mrf.mxu0 }
 0x11e   :  { %v183_v7 = vsub.f32 %v46_v1, %v178_v6 }
 0x11f   :  { %v180_v8 = vpop.f32.mrf.mxu0 }
 0x120   :  { %v184_v9 = vsub.f32 %v595_v26, %v180_v8  ;;  %v185_v11 = vmul.f32 %v183_v7, %v183_v7 }
 0x122   :  { %v186_v10 = vmul.f32 %v184_v9, %v184_v9 }
 0x124   :  { %251 = vmatprep.mubr.f32.mxu1 %v186_v10 }
 0x125   :  { %252 = vmatmul.mubr.f32.vlgmr.msra.gmra.mxu1 %v185_v11 }
 0x1e5   :  { %v253_v24 = vpop.f32.mrf.mxu1 }
 0x1e6   :  { %v254_v25 = vadd.f32 1e-05, %v253_v24 }
 0x1e7   :  { %v255_v26 = vpop.f32.mrf.mxu1 }
 0x1e8   :  { %507 = vrsqrt.f32 %v254_v25  ;;  %v256_v27 = vadd.f32 1e-05, %v255_v26 }
 0x1ea   :  { %509 = vrsqrt.f32 %v256_v27 }
 0x1f5   :  { %v508_v28 = vpop.eup %507 }
 0x1f6   :  { %v260_v30 = vmul.f32 %v508_v28, %v183_v7 }
 0x1f7   :  { %v510_v29 = vpop.eup %509 }
 0x1f8   :  { %v261_v31 = vmul.f32 %v510_v29, %v184_v9  ;;  %v262_v33 = vpack.c.bf16 %v260_v30, %v260_v30 }
 0x1fa   :  { %v263_v32 = vpack.c.bf16 %v261_v31, %v261_v31 }
 0x1fc   :  { %431 = vmatprep.mubr.bf16.mxu0 %v263_v32 }
 0x1fd   :  { %432 = vmatmul.mubr.bf16.vlgmr.msra.gmra.mxu0 %v262_v33 }
 0x2bd   :  { %v479_v34 = vpop.f32.mrf.mxu0 }
 0x2bf   :  { %v480_v36 = vpop.f32.mrf.mxu0 }
 0x2c0   :  { %v481_v37 = vadd.f32 %v480_v36, %v479_v34 }
 0x2c1   :  { %v482_v38 = vpop.f32.mrf.mxu0 }
 0x2c2   :  { %v434_v39 = vadd.f32 %v481_v37, %v446_v35 }
 0x2c3   :  { %v483_v40 = vpop.f32.mrf.mxu0 }
 0x2c4   :  { %439 = vst [vmem:[%s612_s4] sm:$0xff] %v434_v39 }
 0x2c5   :  { %444 = vsyncpa [#allocation3], 1 }
 0x2c6   :  { %445 = vsyncpa [#allocation5], 1 }

</bundles_post_ra>
